<compile_context>
chip_gen: v6e
topology: v6e:2x2x1
jax: 0.10.0
libtpu: 0.0.40
codegen_flags: <defaults>
</compile_context>

<pallas_src>
import functools

import jax
import jax.numpy as jnp
from jax.experimental import pallas as pl
from jax.experimental.pallas import tpu as pltpu


# ---------------------------------------------------------------------------
# Fused one-pass kernel: avgpool -> 1x1 conv -> ReLU -> 1x1 conv -> sigmoid -> gate
# ---------------------------------------------------------------------------
def _ca_fused_kernel(x_ref, w1_ref, w2_ref, o_ref):
    """x_ref/o_ref: (TB, C, HW)   w1_ref: (C, Cr)   w2_ref: (Cr, C)."""
    # AdaptiveAvgPool2d(1): f32 reduce straight off the ref (no f32 tile copy).
    y = jnp.mean(x_ref[...], axis=-1, dtype=jnp.float32)                   # (TB, C)
    z = jnp.maximum(jnp.dot(y, w1_ref[...],
                            preferred_element_type=jnp.float32), 0.0)       # (TB, Cr)
    g = jnp.dot(z, w2_ref[...], preferred_element_type=jnp.float32)         # (TB, C)
    g = pl.reciprocal(1.0 + jnp.exp(-g), approx=False)                      # sigmoid
    # Gate multiply in the native activation dtype (bf16 stays bf16).
    o_ref[...] = x_ref[...] * g[:, :, None].astype(o_ref.dtype)


# ---------------------------------------------------------------------------
# Large-H*W fallback, sweep 1: stream HW chunks, accumulate pool, emit gate.
# ---------------------------------------------------------------------------
def _ca_pool_gate_kernel(x_ref, w1_ref, w2_ref, g_ref, acc_ref, *, inv_hw):
    """x_ref: (1, C, CHUNK)  w1: (C, Cr)  w2: (Cr, C)  g_ref: (1, C, 1)  acc: (1, C) f32."""
    k = pl.program_id(1)

    @pl.when(k == 0)
    def _init():
        acc_ref[...] = jnp.zeros_like(acc_ref)

    acc_ref[...] += jnp.sum(x_ref[...], axis=-1, dtype=jnp.float32)

    @pl.when(k == pl.num_programs(1) - 1)
    def _finalize():
        y = acc_ref[...] * inv_hw                                            # (1, C)
        z = jnp.maximum(jnp.dot(y, w1_ref[...],
                                preferred_element_type=jnp.float32), 0.0)
        g = jnp.dot(z, w2_ref[...], preferred_element_type=jnp.float32)
        g = pl.reciprocal(1.0 + jnp.exp(-g), approx=False)
        g_ref[...] = g[:, :, None]


# ---------------------------------------------------------------------------
# Large-H*W fallback, sweep 2: re-stream HW chunks and apply the gate.
# ---------------------------------------------------------------------------
def _ca_apply_gate_kernel(x_ref, g_ref, o_ref):
    """x_ref/o_ref: (1, C, CHUNK)  g_ref: (1, C, 1) f32."""
    o_ref[...] = x_ref[...] * g_ref[...].astype(o_ref.dtype)


# ---------------------------------------------------------------------------
# Wrapper: block-size / path selection + pallas_call plumbing
# ---------------------------------------------------------------------------
def _vmem_budget():
    try:
        cap = pltpu.get_tpu_info().vmem_capacity_bytes
    except Exception:
        cap = 64 << 20  # assume the smallest per-core VMEM (v7x)
    return int(cap * 0.7)


def _pick_tb(batch, per_batch_tile_bytes, budget):
    """Largest batch-block whose double-buffered (in+out) pipeline fits budget."""
    divisors = [d for d in range(1, batch + 1) if batch % d == 0]
    fitting = [d for d in divisors if 4 * d * per_batch_tile_bytes <= budget]
    if not fitting:
        return None
    # Keep >=2 grid steps when possible so v7x's two TensorCores both get work.
    pool = [d for d in fitting if batch // d >= 2] or fitting
    # Prefer the smallest block still moving >= ~1 MiB/step (amortizes the
    # ~0.35us per-step overhead without giving up pipelining/parallelism).
    big = [d for d in pool if d * per_batch_tile_bytes >= (1 << 20)]
    return min(big) if big else max(pool)


def _pick_hw_chunk(hw, c, itemsize, budget):
    """Largest lane-aligned (multiple of 128) chunk dividing HW that fits budget."""
    best = None
    for chunk in range(128, hw + 1, 128):
        if hw % chunk == 0 and 4 * c * chunk * itemsize <= budget:
            best = chunk
    return best


def ca_layer(x, w1, w2, *, force_chunked=False, hw_chunk=None):
    """CALayer forward: x * sigmoid(conv2(relu(conv1(avgpool(x))))).

    x  : (B, C, H, W)        activations (NCHW, as in PyTorch)
    w1 : (C//r, C, 1, 1)     conv_du[0] weight (bias=False)
    w2 : (C, C//r, 1, 1)     conv_du[2] weight (bias=False)
    """
    B, C, H, W = x.shape
    Cr = w1.shape[0]
    HW = H * W
    item = x.dtype.itemsize
    x3 = x.reshape(B, C, HW)  # free reshape: H*W lands on the lane axis

    # (C, Cr) / (Cr, C) so the pooled (TB, C) row-vectors right-multiply them.
    w1m = jnp.asarray(w1.reshape(Cr, C).T, dtype=jnp.float32)
    w2m = jnp.asarray(w2.reshape(C, Cr).T, dtype=jnp.float32)
    w_bytes = 2 * C * Cr * 4

    budget = _vmem_budget()
    per_batch = C * HW * item
    tb = None if force_chunked else _pick_tb(B, per_batch, budget - 2 * w_bytes)

    if tb is not None:
        # --- fused single pass: x read from HBM once, gated result written once.
        grid_b = B // tb
        tile_bytes = tb * per_batch
        vmem_limit = int(min(budget,
                             max(8 * tile_bytes + 2 * w_bytes + (8 << 20), 16 << 20)))
        out = pl.pallas_call(
            _ca_fused_kernel,
            out_shape=jax.ShapeDtypeStruct((B, C, HW), x.dtype),
            grid=(grid_b,),
            in_specs=[
                pl.BlockSpec((tb, C, HW), lambda b: (b, 0, 0)),
                pl.BlockSpec((C, Cr), lambda b: (0, 0)),
                pl.BlockSpec((Cr, C), lambda b: (0, 0)),
            ],
            out_specs=pl.BlockSpec((tb, C, HW), lambda b: (b, 0, 0)),
            compiler_params=pltpu.CompilerParams(
                dimension_semantics=("parallel",),
                vmem_limit_bytes=vmem_limit),
            cost_estimate=pl.CostEstimate(
                flops=2 * B * C * HW + 4 * B * C * Cr,
                transcendentals=B * C,
                bytes_accessed=2 * B * C * HW * item + w_bytes),
        )(x3, w1m, w2m)
        return out.reshape(B, C, H, W)

    # --- large-H*W fallback: two streamed sweeps over lane-aligned HW chunks.
    chunk = hw_chunk if hw_chunk is not None else _pick_hw_chunk(HW, C, item, budget)
    if chunk is None:
        # TODO(synk): pad or use pl.BoundedSlice when no multiple-of-128 chunk divides HW.
        chunk = HW
    n_k = HW // chunk
    chunk_vmem = int(min(budget,
                         max(4 * C * chunk * item + 2 * w_bytes + (8 << 20), 16 << 20)))

    # Sweep 1: pool accumulation + gate computation -> (B, C, 1) f32 gate.
    gate = pl.pallas_call(
        functools.partial(_ca_pool_gate_kernel, inv_hw=1.0 / float(HW)),
        out_shape=jax.ShapeDtypeStruct((B, C, 1), jnp.float32),
        grid=(B, n_k),
        in_specs=[
            pl.BlockSpec((1, C, chunk), lambda b, k: (b, 0, k)),
            pl.BlockSpec((C, Cr), lambda b, k: (0, 0)),
            pl.BlockSpec((Cr, C), lambda b, k: (0, 0)),
        ],
        out_specs=pl.BlockSpec((1, C, 1), lambda b, k: (b, 0, 0)),
        scratch_shapes=[pltpu.VMEM((1, C), jnp.float32)],
        compiler_params=pltpu.CompilerParams(
            dimension_semantics=("parallel", "arbitrary"),
            vmem_limit_bytes=chunk_vmem),
    )(x3, w1m, w2m)

    # Sweep 2: re-stream x and apply the per-channel gate (lane-dense stores).
    out = pl.pallas_call(
        _ca_apply_gate_kernel,
        out_shape=jax.ShapeDtypeStruct((B, C, HW), x.dtype),
        grid=(B, n_k),
        in_specs=[
            pl.BlockSpec((1, C, chunk), lambda b, k: (b, 0, k)),
            pl.BlockSpec((1, C, 1), lambda b, k: (b, 0, 0)),
        ],
        out_specs=pl.BlockSpec((1, C, chunk), lambda b, k: (b, 0, k)),
        compiler_params=pltpu.CompilerParams(
            dimension_semantics=("parallel", "parallel"),
            vmem_limit_bytes=chunk_vmem),
    )(x3, gate)
    return out.reshape(B, C, H, W)


if __name__ == "__main__":
    key = jax.random.PRNGKey(0)
    kx, k1, k2 = jax.random.split(key, 3)

    B, C, H, W, reduction = 2, 64, 16, 16, 16
    Cr = C // reduction

    x = jax.random.normal(kx, (B, C, H, W), dtype=jnp.float32)
    # PyTorch Conv2d(out, in, 1, 1, bias=False) weight layouts
    w1 = 0.1 * jax.random.normal(k1, (Cr, C, 1, 1), dtype=jnp.float32)
    w2 = 0.1 * jax.random.normal(k2, (C, Cr, 1, 1), dtype=jnp.float32)

    # Pure-JAX reference (eval-mode CALayer forward).
    def reference(xf):
        y = jnp.mean(xf, axis=(2, 3))                                    # (B, C)
        z = jnp.maximum(y @ w1.reshape(Cr, C).T, 0.0)                    # (B, Cr)
        g = 1.0 / (1.0 + jnp.exp(-(z @ w2.reshape(C, Cr).T)))            # (B, C)
        return xf * g[:, :, None, None]

    ref = reference(x)

    # 1) fused single-pass path, f32
    out = jax.jit(ca_layer)(x, w1, w2)
    jax.block_until_ready(out)
    assert out.shape == (B, C, H, W), out.shape
    assert bool(jnp.all(jnp.isfinite(out)))
    assert bool(jnp.allclose(out, ref, atol=1e-5, rtol=1e-5)), \
        float(jnp.max(jnp.abs(out - ref)))

    # 2) large-H*W two-sweep fallback path, forced with 128-lane chunks, f32
    out_c = jax.jit(functools.partial(ca_layer, force_chunked=True, hw_chunk=128))(x, w1, w2)
    jax.block_until_ready(out_c)
    assert bool(jnp.allclose(out_c, ref, atol=1e-5, rtol=1e-5)), \
        float(jnp.max(jnp.abs(out_c - ref)))

    # 3) bf16 activations stay bf16 end-to-end (pool/gate math in f32)
    xb = x.astype(jnp.bfloat16)
    out_b = jax.jit(ca_layer)(xb, w1, w2)
    jax.block_until_ready(out_b)
    ref_b = reference(xb.astype(jnp.float32))
    assert out_b.dtype == jnp.bfloat16
    assert bool(jnp.allclose(out_b.astype(jnp.float32), ref_b, atol=3e-2, rtol=3e-2))

    print("KERNEL_OK")
</pallas_src>

<mosaic_0001>
module attributes {stable_mosaic.version = 11 : i64} {
  func.func @_ca_fused_kernel(%arg0: i32, %arg1: memref<1x64x256xf32, #tpu.memory_space<vmem>>, %arg2: memref<64x4xf32, #tpu.memory_space<vmem>>, %arg3: memref<4x64xf32, #tpu.memory_space<vmem>>, %arg4: memref<1x64x256xf32, #tpu.memory_space<vmem>>) attributes {dimension_semantics = [#tpu.dimension_semantics<parallel>], iteration_bounds = array<i64: 2>, scalar_prefetch = 0 : i64, scratch_operands = 0 : i64, tpu.core_type = #tpu.core_type<tc>, window_params = [{transform_indices = @transform_0, window_bounds = array<i64: 1, 64, 256>}, {pipeline_mode = #tpu.pipeline_mode<synchronous>, transform_indices = @transform_1, window_bounds = array<i64: 64, 4>}, {pipeline_mode = #tpu.pipeline_mode<synchronous>, transform_indices = @transform_2, window_bounds = array<i64: 4, 64>}, {transform_indices = @transform_3, window_bounds = array<i64: 1, 64, 256>}]} {
    %c0 = arith.constant 0 : index
    %c0_0 = arith.constant 0 : index
    %c0_1 = arith.constant 0 : index
    %0 = vector.load %arg1[%c0, %c0_0, %c0_1] : memref<1x64x256xf32, #tpu.memory_space<vmem>>, vector<1x64x256xf32>
    %cst = arith.constant dense<0.000000e+00> : vector<1x64xf32>
    %1 = vector.multi_reduction <add>, %0, %cst [2] : vector<1x64x256xf32> to vector<1x64xf32>
    %cst_2 = arith.constant 2.560000e+02 : f32
    %2 = vector.broadcast %cst_2 : f32 to vector<1x64xf32>
    %3 = arith.divf %1, %2 : vector<1x64xf32>
    %c0_3 = arith.constant 0 : index
    %c0_4 = arith.constant 0 : index
    %4 = vector.load %arg2[%c0_3, %c0_4] : memref<64x4xf32, #tpu.memory_space<vmem>>, vector<64x4xf32>
    %cst_5 = arith.constant dense<0.000000e+00> : vector<1x4xf32>
    %5 = tpu.matmul %3, %4, %cst_5 {dimension_numbers = #tpu.dot_dimension_numbers<[1], [0], [0], [1], [0, 0, 1, 1], [], []>} : vector<1x64xf32>, vector<64x4xf32>, vector<1x4xf32> -> vector<1x4xf32>
    %cst_6 = arith.constant 0.000000e+00 : f32
    %6 = vector.broadcast %cst_6 : f32 to vector<1x4xf32>
    %7 = arith.maximumf %5, %6 : vector<1x4xf32>
    %c0_7 = arith.constant 0 : index
    %c0_8 = arith.constant 0 : index
    %8 = vector.load %arg3[%c0_7, %c0_8] : memref<4x64xf32, #tpu.memory_space<vmem>>, vector<4x64xf32>
    %cst_9 = arith.constant dense<0.000000e+00> : vector<1x64xf32>
    %9 = tpu.matmul %7, %8, %cst_9 {dimension_numbers = #tpu.dot_dimension_numbers<[1], [0], [0], [1], [0, 0, 1, 1], [], []>} : vector<1x4xf32>, vector<4x64xf32>, vector<1x64xf32> -> vector<1x64xf32>
    %cst_10 = arith.constant 0.000000e+00 : f32
    %10 = vector.broadcast %cst_10 : f32 to vector<1x64xf32>
    %11 = arith.subf %10, %9 : vector<1x64xf32>
    %12 = math.exp %11 : vector<1x64xf32>
    %cst_11 = arith.constant 1.000000e+00 : f32
    %13 = vector.broadcast %cst_11 : f32 to vector<1x64xf32>
    %14 = arith.addf %13, %12 : vector<1x64xf32>
    %15 = tpu.reciprocal %14 : vector<1x64xf32> -> vector<1x64xf32>
    %c0_12 = arith.constant 0 : index
    %c0_13 = arith.constant 0 : index
    %c0_14 = arith.constant 0 : index
    %16 = vector.load %arg1[%c0_12, %c0_13, %c0_14] : memref<1x64x256xf32, #tpu.memory_space<vmem>>, vector<1x64x256xf32>
    %17 = vector.shape_cast %15 : vector<1x64xf32> to vector<1x64x1xf32>
    %18 = vector.broadcast %17 : vector<1x64x1xf32> to vector<1x64x256xf32>
    %19 = arith.mulf %16, %18 : vector<1x64x256xf32>
    %c0_15 = arith.constant 0 : index
    %c0_16 = arith.constant 0 : index
    %c0_17 = arith.constant 0 : index
    %20 = vector.load %arg4[%c0_15, %c0_16, %c0_17] : memref<1x64x256xf32, #tpu.memory_space<vmem>>, vector<1x64x256xf32>
    tpu.vector_store %arg4[%c0_15, %c0_16, %c0_17], %19 {strides = array<i32>} : memref<1x64x256xf32, #tpu.memory_space<vmem>>, vector<1x64x256xf32>,
    return
  }
  func.func @transform_0(%arg0: i32) -> (i32, i32, i32) {
    %c0_i32 = arith.constant 0 : i32
    %c0_i32_0 = arith.constant 0 : i32
    %c0_i32_1 = arith.constant 0 : i32
    return %arg0, %c0_i32, %c0_i32_0 : i32, i32, i32
  }
  func.func @transform_1(%arg0: i32) -> (i32, i32) {
    %c0_i32 = arith.constant 0 : i32
    %c0_i32_0 = arith.constant 0 : i32
    %c0_i32_1 = arith.constant 0 : i32
    return %c0_i32, %c0_i32_0 : i32, i32
  }
  func.func @transform_2(%arg0: i32) -> (i32, i32) {
    %c0_i32 = arith.constant 0 : i32
    %c0_i32_0 = arith.constant 0 : i32
    %c0_i32_1 = arith.constant 0 : i32
    return %c0_i32, %c0_i32_0 : i32, i32
  }
  func.func @transform_3(%arg0: i32) -> (i32, i32, i32) {
    %c0_i32 = arith.constant 0 : i32
    %c0_i32_0 = arith.constant 0 : i32
    %c0_i32_1 = arith.constant 0 : i32
    return %arg0, %c0_i32, %c0_i32_0 : i32, i32, i32
  }
}

</mosaic_0001>

<bundles_post_ra>
// kernel: ca_layer.1
= control target key start
LH: loop header
LB: loop body
LE: loop exit
PB: predicated region body
PF: predicated region fallthrough
CT: control target
= control target key end

     0   :  { %s666_s12 = smov 0   ;;  %s811_s0 = inlined_call_operand.vmem [shape: f32[2,64,256], index: 0, kind: input, shape index: {}]   ;;  %s812_s1 = inlined_call_operand.vmem [shape: f32[64,4], index: 1, kind: input, shape index: {}]   ;;  %s813_s2 = inlined_call_operand.vmem [shape: f32[4,64], index: 2, kind: input, shape index: {}]   ;;  %s814_s3 = inlined_call_operand.vmem [shape: f32[2,64,256], index: 3, kind: output, shape index: {}]  }
   0x1 LB: > { %s571_s13 = sadd.s32 4294967295, %s642_s12   ;;  %p575_p0 = scmp.ge.s32.totalorder %s642_s12, 1  ;;  %s642_s12 = sphi %s666_s12, %s13_s12  }
   0x2   : > { %p137_p1 = scmp.lt.s32.totalorder %s642_s12, 3 }
   0x4   : > { %p138_p2 = pnand %p575_p0, %p137_p1 }
   0x5   : > { %p161_p3 = scmp.lt.s32.totalorder (!%p138_p2), %s571_s13, 1 }
   0x6   : > { %141 = sbr.rel (%p138_p2) target bundleno = 731 (0x2db), region = 32 }
   0xb   : > { %s816_s13 = smov (!%p161_p3, %s571_s13), 1  ;;  %v644_v24 = vmov 0.0   ;;  %v227_v25 = vld [vmem:[%s812_s1 + $0x38] sm:$0xff]  ;;  %v226_v26 = vld [vmem:[%s812_s1 + $0x30] sm:$0xff]  ;;  %v225_v27 = vld [vmem:[%s812_s1 + $0x28] sm:$0xff]  ;;  %vm645_vm0 = vmmov 0   ;;  %v236_v33 = vlaneseq }
   0xc   : > { %s585_s14 = sshll.u32 %s816_s13, 7  ;;  %598 = vmatprep.subr.mxu0 %v644_v24  ;;  %617 = vmatprep.subr.mxu1 %v644_v24  ;;  %v224_v28 = vld [vmem:[%s812_s1 + $0x20] sm:$0xff]  ;;  %v223_v29 = vld [vmem:[%s812_s1 + $0x18] sm:$0xff]  ;;  %v222_v30 = vld [vmem:[%s812_s1 + $0x10] sm:$0xff]  ;;  %vm247_vm1 = vcmask 130112   ;;  %vm254_vm2 = vcmask 195712  }
   0xd   : > { %s165_s17 = scalar_lea.vmem %s811_s0, %s585_s14  ;;  %599 = vmatpush3.msra.mxu0 %v227_v25  ;;  %v221_v31 = vld [vmem:[%s812_s1 + $0x8] sm:$0xff]  ;;  %v220_v32 = vld [vmem:[%s812_s1] sm:$0xff]  ;;  %614 = vmatprep.mubr.msk.f32.mxu0 %vm645_vm0, %v644_v24  ;;  %v237_v34 = vand.u32 127, %v236_v33  ;;  %v754_v35 = vshrl.u32 %v236_v33, 7  ;;  %vm261_vm3 = vcmask 261312   ;;  %vm268_vm4 = vcmask 326912   ;;  %s774_s11 = scalar_lea.vmem %s814_s3, %s585_s14 }
   0xe   : > { %v682_v0 = vld [vmem:[%s165_s17] sm:$0xff]  ;;  %v684_v1 = vld [vmem:[%s165_s17 + $0x8] sm:$0xff]  ;;  %v692_v5 = vld [vmem:[%s165_s17 + $0x10] sm:$0xff]  ;;  %600 = vmatprep.subr.mxu0 %v644_v24  ;;  %619 = vmatprep.mubr.msk.f32.mxu1 %vm645_vm0, %v644_v24  ;;  %vm275_vm5 = vcmask 392512   ;;  %vm282_vm6 = vcmask 458112   ;;  %vm289_vm7 = vcmask 523712  }
   0xf   : > { %v686_v2 = vld [vmem:[%s165_s17 + $0x20] sm:$0xff]  ;;  %v187_v3 = vadd.f32 %v684_v1, %v682_v0  ;;  %v690_v4 = vld [vmem:[%s165_s17 + $0x28] sm:$0xff]  ;;  %v694_v6 = vld [vmem:[%s165_s17 + $0x18] sm:$0xff]  ;;  %601 = vmatpush3.msra.mxu0 %v226_v26  ;;  %v242_v36 = vadd.s32 4294967288, %v237_v34  ;;  %v249_v38 = vadd.s32 4294967280, %v237_v34  ;;  %v256_v39 = vadd.s32 4294967272, %v237_v34 }
  0x10   : > { %v193_v7 = vadd.f32 %v690_v4, %v686_v2  ;;  %v698_v8 = vld [vmem:[%s165_s17 + $0x30] sm:$0xff]  ;;  %v700_v9 = vld [vmem:[%s165_s17 + $0x38] sm:$0xff]  ;;  %v190_v10 = vadd.f32 %v694_v6, %v692_v5  ;;  %v706_v12 = vld [vmem:[%s165_s17 + $0x40] sm:$0xff]  ;;  %602 = vmatprep.subr.mxu0 %v644_v24  ;;  %v240_v41 = vsub.s32 %v237_v34, %v754_v35  ;;  %v263_v44 = vadd.s32 4294967264, %v237_v34 }
  0x11   : > { %188 = vadd.xlane.f32.xlu0 %v187_v3  ;;  %v196_v11 = vadd.f32 %v700_v9, %v698_v8  ;;  %v708_v13 = vld [vmem:[%s165_s17 + $0x48] sm:$0xff]  ;;  %v710_v14 = vld [vmem:[%s165_s17 + $0x50] sm:$0xff]  ;;  %v712_v15 = vld [vmem:[%s165_s17 + $0x58] sm:$0xff]  ;;  %603 = vmatpush3.msra.mxu0 %v225_v27  ;;  %v245_v43 = vsub.s32 %v242_v36, %v754_v35  ;;  %v252_v45 = vsub.s32 %v249_v38, %v754_v35  ;;  %v270_v49 = vadd.s32 4294967256, %v237_v34 }
  0x12   : > { %194 = vadd.xlane.f32.xlu1 %v193_v7  ;;  %v199_v16 = vadd.f32 %v708_v13, %v706_v12  ;;  %v202_v17 = vadd.f32 %v712_v15, %v710_v14  ;;  %v718_v18 = vld [vmem:[%s165_s17 + $0x60] sm:$0xff]  ;;  %v720_v19 = vld [vmem:[%s165_s17 + $0x68] sm:$0xff]  ;;  %v722_v20 = vld [vmem:[%s165_s17 + $0x70] sm:$0xff]  ;;  %604 = vmatprep.subr.mxu0 %v644_v24  ;;  %v259_v48 = vsub.s32 %v256_v39, %v754_v35  ;;  %v277_v56 = vadd.s32 4294967248, %v237_v34 }
  0x13   : > { %v724_v21 = vld [vmem:[%s165_s17 + $0x78] sm:$0xff]  ;;  %v205_v22 = vadd.f32 %v720_v19, %v718_v18  ;;  %605 = vmatpush3.msra.mxu0 %v224_v28  ;;  %v266_v55 = vsub.s32 %v263_v44, %v754_v35  ;;  %v273_v60 = vsub.s32 %v270_v49, %v754_v35  ;;  %v284_v61 = vadd.s32 4294967240, %v237_v34  ;;  %v365_v34 = vld [vmem:[%s813_s2] sm:$0xf] }
  0x14   : > { %v208_v23 = vadd.f32 %v724_v21, %v722_v20  ;;  %606 = vmatprep.subr.mxu0 %v644_v24  ;;  %vm291_vm8 = vcmask 523264   ;;  %vm370_vm9 = vcmask 1043456   ;;  %vm366_vm10 = vcmask 31744  }
  0x15   : > { %191 = vadd.xlane.f32.xlu0 %v190_v10  ;;  %607 = vmatpush3.msra.mxu0 %v223_v29 }
  0x16   : > { %197 = vadd.xlane.f32.xlu1 %v196_v11  ;;  %608 = vmatprep.subr.mxu0 %v644_v24 }
  0x17   : > { %609 = vmatpush3.msra.mxu0 %v222_v30  ;;  %618 = vmatpush3.msk.msra.mxu1 %vm370_vm9, %v365_v34 }
  0x18   : > { %610 = vmatprep.subr.mxu0 %v644_v24 }
  0x19   : > { %200 = vadd.xlane.f32.xlu0 %v199_v16  ;;  %611 = vmatpush3.msra.mxu0 %v221_v31 }
  0x1a   : > { %203 = vadd.xlane.f32.xlu1 %v202_v17  ;;  %612 = vmatprep.subr.mxu0 %v644_v24  ;;  %v280_v17 = vsub.s32 %v277_v56, %v754_v35  ;;  %v287_v24 = vsub.s32 %v284_v61, %v754_v35 }
  0x1b   : > { %613 = vmatpush3.msra.mxu0 %v220_v32 }
  0x1d   : > { %206 = vadd.xlane.f32.xlu0 %v205_v22 }
  0x1e   : > { %209 = vadd.xlane.f32.xlu1 %v208_v23 }
  0x9a   : > { %v189_v37 = vpop.xlane.xlu0 %188 }
  0x9b   : > { %v195_v40 = vpop.xlane.xlu1 %194  ;;  %v212_v42 = vmul.f32 0.00390625, %v189_v37 }
  0x9c   : > { %v214_v46 = vmul.f32 0.00390625, %v195_v40 }
  0x9d   : > { %v241_v53 = vrot.slane %v212_v42, %v240_v41 }
  0x9e   : > { %v192_v47 = vpop.xlane.xlu0 %191  ;;  %v253_v57 = vrot.slane %v214_v46, %v252_v45  ;;  %v451_v45 = vsub.s32 0, %v754_v35 }
  0x9f   : > { %v213_v50 = vmul.f32 0.00390625, %v192_v47  ;;  %v198_v51 = vpop.xlane.xlu1 %197 }
  0xa0   : > { %v215_v52 = vmul.f32 0.00390625, %v198_v51 }
  0xa1   : > { %v246_v54 = vrot.slane %v213_v50, %v245_v43 }
  0xa2   : > { %v260_v58 = vrot.slane %v215_v52, %v259_v48  ;;  %v201_v59 = vpop.xlane.xlu0 %200 }
  0xa3   : > { %v248_v62 = vsel %vm247_vm1, %v246_v54, %v241_v53  ;;  %v216_v63 = vmul.f32 0.00390625, %v201_v59  ;;  %v204_v3 = vpop.xlane.xlu1 %203 }
  0xa4   : > { %v255_v7 = vsel %vm254_vm2, %v253_v57, %v248_v62  ;;  %v217_v10 = vmul.f32 0.00390625, %v204_v3 }
  0xa5   : > { %v262_v11 = vsel %vm261_vm3, %v260_v58, %v255_v7  ;;  %v267_v16 = vrot.slane %v216_v63, %v266_v55 }
  0xa6   : > { %v274_v22 = vrot.slane %v217_v10, %v273_v60  ;;  %v207_v23 = vpop.xlane.xlu0 %206 }
  0xa7   : > { %v269_v25 = vsel %vm268_vm4, %v267_v16, %v262_v11  ;;  %v218_v26 = vmul.f32 0.00390625, %v207_v23  ;;  %v210_v27 = vpop.xlane.xlu1 %209 }
  0xa8   : > { %v219_v28 = vmul.f32 0.00390625, %v210_v27  ;;  %v276_v30 = vsel %vm275_vm5, %v274_v22, %v269_v25 }
  0xa9   : > { %v281_v29 = vrot.slane %v218_v26, %v280_v17 }
  0xaa   : > { %v288_v31 = vrot.slane %v219_v28, %v287_v24 }
  0xab   : > { %v283_v32 = vsel %vm282_vm6, %v281_v29, %v276_v30 }
  0xac   : > { %v290_v33 = vsel %vm289_vm7, %v288_v31, %v283_v32 }
  0xad   : > { %615 = vmatmul.mubr.msk.f32.vlgmr.msra.gmra.mxu0 %vm291_vm8, %v290_v33 }
 0x16d   : > { %v360_v36 = vpop.f32.mrf.mxu0 }
 0x16e   : > { %v364_v37 = vmax.f32 %v360_v36, 0.0 }
 0x16f   : > { %v616_v38 = vpop.f32.mrf.mxu0 }
 0x170   : > { %620 = vmatmul.mubr.msk.f32.vlgmr.msra.gmra.mxu1 %vm366_vm10, %v364_v37 }
 0x230   : > { %v440_v39 = vpop.f32.mrf.mxu1 }
 0x231   : > { %v444_v40 = vsub.f32 0.0, %v440_v39 }
 0x232   : > { %v621_v41 = vpop.f32.mrf.mxu1 }
 0x233   : > { %v445_v42 = vmul.f32 1.442695, %v444_v40 }
 0x235   : > { %632 = vpow2.f32 %v445_v42 }
 0x242   : > { %v633_v43 = vpop.eup %632 }
 0x243   : > { %v447_v44 = vadd.f32 1.0, %v633_v43 }
 0x245   : > { %634 = vrcp.f32 %v447_v44 }
 0x252   : > { %v635_v46 = vpop.eup %634 }
 0x253   : > { %v452_v47 = vrot.slane %v635_v46, %v451_v45 }
 0x255   : > { %458 = vbcast.lane.b32.xlu1 %v452_v47, 264  ;;  %454 = vbcast.lane.b32.xlu0 %v452_v47, 256 }
 0x259   : > { %462 = vbcast.lane.b32.xlu1 %v452_v47, 272  ;;  %470 = vbcast.lane.b32.xlu0 %v452_v47, 288 }
 0x25d   : > { %466 = vbcast.lane.b32.xlu1 %v452_v47, 280  ;;  %478 = vbcast.lane.b32.xlu0 %v452_v47, 304 }
 0x261   : > { %474 = vbcast.lane.b32.xlu1 %v452_v47, 296 }
 0x265   : > { %482 = vbcast.lane.b32.xlu1 %v452_v47, 312 }
 0x2c7   : > { %v459_v35 = vpop.permute.xlu1 %458  ;;  %v455_v48 = vpop.permute.xlu0 %454 }
 0x2c8   : > { %v486_v49 = vmul.f32 %v459_v35, %v692_v5  ;;  %v487_v50 = vmul.f32 %v459_v35, %v694_v6  ;;  %v484_v51 = vmul.f32 %v455_v48, %v682_v0  ;;  %v485_v52 = vmul.f32 %v455_v48, %v684_v1 }
 0x2ca   : > { %502 = vst [vmem:[%s774_s11 + $0x10] sm:$0xff] %v486_v49  ;;  %503 = vst [vmem:[%s774_s11 + $0x18] sm:$0xff] %v487_v50 }
 0x2cb   : > { %500 = vst [vmem:[%s774_s11] sm:$0xff] %v484_v51  ;;  %501 = vst [vmem:[%s774_s11 + $0x8] sm:$0xff] %v485_v52  ;;  %v463_v53 = vpop.permute.xlu1 %462  ;;  %v471_v54 = vpop.permute.xlu0 %470 }
 0x2cc   : > { %v488_v55 = vmul.f32 %v463_v53, %v686_v2  ;;  %v489_v5 = vmul.f32 %v463_v53, %v690_v4  ;;  %v492_v6 = vmul.f32 %v471_v54, %v706_v12  ;;  %v493_v0 = vmul.f32 %v471_v54, %v708_v13 }
 0x2ce   : > { %504 = vst [vmem:[%s774_s11 + $0x20] sm:$0xff] %v488_v55  ;;  %505 = vst [vmem:[%s774_s11 + $0x28] sm:$0xff] %v489_v5 }
 0x2cf   : > { %508 = vst [vmem:[%s774_s11 + $0x40] sm:$0xff] %v492_v6  ;;  %509 = vst [vmem:[%s774_s11 + $0x48] sm:$0xff] %v493_v0  ;;  %v467_v1 = vpop.permute.xlu1 %466  ;;  %v479_v56 = vpop.permute.xlu0 %478 }
 0x2d0   : > { %v490_v57 = vmul.f32 %v467_v1, %v698_v8  ;;  %v491_v2 = vmul.f32 %v467_v1, %v700_v9  ;;  %v496_v4 = vmul.f32 %v479_v56, %v718_v18  ;;  %v497_v12 = vmul.f32 %v479_v56, %v720_v19 }
 0x2d2   : > { %506 = vst [vmem:[%s774_s11 + $0x30] sm:$0xff] %v490_v57  ;;  %507 = vst [vmem:[%s774_s11 + $0x38] sm:$0xff] %v491_v2 }
 0x2d3   : > { %512 = vst [vmem:[%s774_s11 + $0x60] sm:$0xff] %v496_v4  ;;  %513 = vst [vmem:[%s774_s11 + $0x68] sm:$0xff] %v497_v12  ;;  %v475_v13 = vpop.permute.xlu1 %474 }
 0x2d4   : > { %v494_v58 = vmul.f32 %v475_v13, %v710_v14  ;;  %v495_v59 = vmul.f32 %v475_v13, %v712_v15 }
 0x2d6   : > { %510 = vst [vmem:[%s774_s11 + $0x50] sm:$0xff] %v494_v58  ;;  %511 = vst [vmem:[%s774_s11 + $0x58] sm:$0xff] %v495_v59 }
 0x2d7   : > { %v483_v8 = vpop.permute.xlu1 %482 }
 0x2d8   : > { %v498_v60 = vmul.f32 %v483_v8, %v722_v20  ;;  %v499_v9 = vmul.f32 %v483_v8, %v724_v21 }
 0x2da   : > { %514 = vst [vmem:[%s774_s11 + $0x70] sm:$0xff] %v498_v60  ;;  %515 = vst [vmem:[%s774_s11 + $0x78] sm:$0xff] %v499_v9 }
 0x2db PF: > { %s13_s12 = sadd.s32 1, %s642_s12  }
 0x2dc   : > { %p10_p4 = scmp.ge.s32.totalorder %s13_s12, 4  }
 0x2de   :  { %12 = sbr.rel (!%p10_p4) target bundleno = 1 (0x1), region = 62 }

</bundles_post_ra>
